<compile_context>
chip_gen: v7x
topology: tpu7x:2x2x1
jax: 0.10.0
libtpu: 0.0.40
codegen_flags: <defaults>
</compile_context>

<pallas_src>
import functools
import math

import jax
import jax.numpy as jnp
from jax.experimental import pallas as pl
from jax.experimental.pallas import tpu as pltpu


def _convblock_kernel(x_ref, w1c_ref, b1_ref, w2c_ref, b2_ref, o_ref, *, h_img):
    """Single grid step over all N*H rows.

    x_ref:   (M, W*Cin_p)            bf16, lane index = w*Cin_p + c, M = N*H
    w1c_ref: (3*W*Cin_p,  W*Cout_p)  bf16 concatenated block-Toeplitz (ky=0,1,2)
    b1_ref:  (1, W*Cout_p)           f32 bias tiled over W
    w2c_ref: (3*W*Cout_p, W*Cout_p)  bf16
    b2_ref:  (1, W*Cout_p)           f32
    o_ref:   (M, W*Cout_p)           output rows
    """

    def conv3x3_relu(a, wcat_ref, bias):
        # a: (M, K) f32.  One fused MXU dot: concat the 3 ky-shifted copies
        # along lanes (128-aligned offsets -> cheap) against the pre-stacked
        # (3K, W*Cout_p) weight slab.  Row shifts are XLU sublane rolls; the
        # top/bottom "same" zero padding of EACH image is the row%H mask, so
        # nothing leaks across image boundaries after folding N into M.
        m = a.shape[0]
        row_in_img = jax.lax.broadcasted_iota(jnp.int32, a.shape, 0) % h_img
        # ky = 0: output row y reads input row y-1 (roll down, zero top rows).
        a_dn = jnp.where(row_in_img == 0, 0.0, pltpu.roll(a, shift=1, axis=0))
        # ky = 2: output row y reads input row y+1 (roll up, zero bottom rows).
        a_up = jnp.where(row_in_img == h_img - 1, 0.0,
                         pltpu.roll(a, shift=m - 1, axis=0))
        a_cat = jnp.concatenate([a_dn, a, a_up], axis=1).astype(jnp.bfloat16)
        acc = jnp.dot(a_cat, wcat_ref[...], preferred_element_type=jnp.float32)
        return jnp.maximum(acc + bias, 0.0)

    x = x_ref[...].astype(jnp.float32)                  # (M, W*Cin_p)
    h = conv3x3_relu(x, w1c_ref, b1_ref[...])           # (M, W*Cout_p)
    out = conv3x3_relu(h, w2c_ref, b2_ref[...])         # (M, W*Cout_p)
    o_ref[...] = out.astype(o_ref.dtype)


def _pad_channels_to_lane(c, w, lane=128):
    """Smallest c_p >= c such that w * c_p is a multiple of the lane width."""
    step = lane // math.gcd(w, lane)
    return ((c + step - 1) // step) * step


def _toeplitz_weights_cat(w_hwio, W):
    """(3, 3, Cin, Cout) -> (3*W*Cin, W*Cout) concatenated block-Toeplitz.

    t[ky*W*Cin + s*Cin + c, x*Cout + o] = w_hwio[ky, kx, c, o] with
    s = x + kx - 1; entries with s outside [0, W) are omitted, which realizes
    the left/right 'same' zero padding.  ky blocks are stacked along K in the
    order (0, 1, 2) to match concat([a_dn, a, a_up]) in the kernel.
    """
    _, _, Cin, Cout = w_hwio.shape
    bands = jnp.stack(
        [jnp.eye(W, k=1 - kx, dtype=w_hwio.dtype) for kx in range(3)])
    t = jnp.einsum('asx,kaco->kscxo', bands, w_hwio)    # (3, W, Cin, W, Cout)
    return t.reshape(3 * W * Cin, W * Cout)


def fold_convblock_params(w1, b1, w2, b2, W):
    """Fold PyTorch-layout conv weights into bf16 Toeplitz slabs (done once)."""
    Cout, Cin, _, _ = w1.shape
    Cin_p = _pad_channels_to_lane(Cin, W)
    Cout_p = _pad_channels_to_lane(Cout, W)

    def to_hwio_padded(w_oihw, cin, cin_p, cout, cout_p):
        w = jnp.transpose(w_oihw, (2, 3, 1, 0))          # (3, 3, Cin, Cout)
        return jnp.pad(w, ((0, 0), (0, 0), (0, cin_p - cin), (0, cout_p - cout)))

    w1c = _toeplitz_weights_cat(
        to_hwio_padded(w1, Cin, Cin_p, Cout, Cout_p), W).astype(jnp.bfloat16)
    w2c = _toeplitz_weights_cat(
        to_hwio_padded(w2, Cout, Cout_p, Cout, Cout_p), W).astype(jnp.bfloat16)
    b1t = jnp.tile(jnp.pad(b1, (0, Cout_p - Cout)), W).reshape(1, W * Cout_p)
    b2t = jnp.tile(jnp.pad(b2, (0, Cout_p - Cout)), W).reshape(1, W * Cout_p)
    return w1c, b1t.astype(jnp.float32), w2c, b2t.astype(jnp.float32)


def convblock_apply(x_nchw, w1c, b1t, w2c, b2t, *, out_channels):
    """x_nchw: (N, Cin, H, W) -> (N, out_channels, H, W)."""
    N, Cin, H, W = x_nchw.shape
    WCin_p = w1c.shape[0] // 3
    WCout_p = w1c.shape[1]
    Cin_p = WCin_p // W
    rows = N * H

    # Layout glue only (NCHW contract of the module); padded channels are zero.
    x_nhwc = jnp.transpose(x_nchw, (0, 2, 3, 1))
    x_nhwc = jnp.pad(x_nhwc, ((0, 0), (0, 0), (0, 0), (0, Cin_p - Cin)))
    x_rows = x_nhwc.reshape(rows, WCin_p).astype(jnp.bfloat16)

    out_rows = pl.pallas_call(
        functools.partial(_convblock_kernel, h_img=H),
        out_shape=jax.ShapeDtypeStruct((rows, WCout_p), x_nchw.dtype),
        grid_spec=pltpu.PrefetchScalarGridSpec(
            num_scalar_prefetch=0,
            grid=(1,),   # whole batch in one MXU-friendly block (M = N*H)
            in_specs=[
                pl.BlockSpec((rows, WCin_p), lambda i: (i, 0)),
                pl.BlockSpec((3 * WCin_p, WCout_p), lambda i: (0, 0)),
                pl.BlockSpec((1, WCout_p), lambda i: (0, 0)),
                pl.BlockSpec((3 * WCout_p, WCout_p), lambda i: (0, 0)),
                pl.BlockSpec((1, WCout_p), lambda i: (0, 0)),
            ],
            out_specs=pl.BlockSpec((rows, WCout_p), lambda i: (i, 0)),
        ),
        compiler_params=pltpu.CompilerParams(
            dimension_semantics=("arbitrary",)),
    )(x_rows, w1c, b1t, w2c, b2t)

    out_nhwc = out_rows.reshape(N, H, W, WCout_p // W)[..., :out_channels]
    return jnp.transpose(out_nhwc, (0, 3, 1, 2))          # back to NCHW


def _reference(x, w1, b1, w2, b2):
    dn = ("NCHW", "OIHW", "NCHW")
    y = jax.lax.conv_general_dilated(x, w1, (1, 1), "SAME",
                                     dimension_numbers=dn)
    y = jnp.maximum(y + b1[None, :, None, None], 0.0)
    y = jax.lax.conv_general_dilated(y, w2, (1, 1), "SAME",
                                     dimension_numbers=dn)
    return jnp.maximum(y + b2[None, :, None, None], 0.0)


if __name__ == "__main__":
    N, Cin, Cout, H, W = 2, 4, 8, 16, 16

    key = jax.random.PRNGKey(0)
    k1, k2, k3, k4, k5 = jax.random.split(key, 5)
    x = jax.random.normal(k1, (N, Cin, H, W), jnp.float32)
    w1 = jax.random.normal(k2, (Cout, Cin, 3, 3), jnp.float32) / jnp.sqrt(Cin * 9.0)
    b1 = jax.random.normal(k3, (Cout,), jnp.float32) * 0.01
    w2 = jax.random.normal(k4, (Cout, Cout, 3, 3), jnp.float32) / jnp.sqrt(Cout * 9.0)
    b2 = jax.random.normal(k5, (Cout,), jnp.float32) * 0.01

    # Fold weights once (inference-style caching, outside the per-call path).
    folded = fold_convblock_params(w1, b1, w2, b2, W)

    fwd = jax.jit(functools.partial(convblock_apply, out_channels=Cout))
    out = fwd(x, *folded)
    out = jax.block_until_ready(out)

    ref = _reference(x, w1, b1, w2, b2)
    assert out.shape == (N, Cout, H, W), out.shape
    # bf16 MXU operands with f32 accumulation -> relaxed tolerance.
    assert jnp.allclose(out, ref, atol=8e-2, rtol=5e-2), \
        "mismatch vs XLA conv reference"

    print("KERNEL_OK")
</pallas_src>

<mosaic_0001>
module attributes {stable_mosaic.version = 11 : i64} {
  func.func @_convblock_kernel(%arg0: i32, %arg1: memref<32x128xbf16, #tpu.memory_space<vmem>>, %arg2: memref<384x128xbf16, #tpu.memory_space<vmem>>, %arg3: memref<1x128xf32, #tpu.memory_space<vmem>>, %arg4: memref<384x128xbf16, #tpu.memory_space<vmem>>, %arg5: memref<1x128xf32, #tpu.memory_space<vmem>>, %arg6: memref<32x128xf32, #tpu.memory_space<vmem>>) attributes {dimension_semantics = [#tpu.dimension_semantics<arbitrary>], iteration_bounds = array<i64: 1>, scalar_prefetch = 0 : i64, scratch_operands = 0 : i64, tpu.core_type = #tpu.core_type<tc>, window_params = [{transform_indices = @transform_0, window_bounds = array<i64: 32, 128>}, {pipeline_mode = #tpu.pipeline_mode<synchronous>, transform_indices = @transform_1, window_bounds = array<i64: 384, 128>}, {pipeline_mode = #tpu.pipeline_mode<synchronous>, transform_indices = @transform_2, window_bounds = array<i64: 1, 128>}, {pipeline_mode = #tpu.pipeline_mode<synchronous>, transform_indices = @transform_3, window_bounds = array<i64: 384, 128>}, {pipeline_mode = #tpu.pipeline_mode<synchronous>, transform_indices = @transform_4, window_bounds = array<i64: 1, 128>}, {transform_indices = @transform_5, window_bounds = array<i64: 32, 128>}]} {
    %c0 = arith.constant 0 : index
    %c0_0 = arith.constant 0 : index
    %0 = vector.load %arg1[%c0, %c0_0] : memref<32x128xbf16, #tpu.memory_space<vmem>>, vector<32x128xbf16>
    %1 = arith.extf %0 : vector<32x128xbf16> to vector<32x128xf32>
    %c0_1 = arith.constant 0 : index
    %c0_2 = arith.constant 0 : index
    %2 = vector.load %arg3[%c0_1, %c0_2] : memref<1x128xf32, #tpu.memory_space<vmem>>, vector<1x128xf32>
    %3 = tpu.iota {dimensions = array<i32: 0>} : vector<32x128xi32>
    %c16_i32 = arith.constant 16 : i32
    %c0_i32 = arith.constant 0 : i32
    %4 = arith.cmpi eq, %c16_i32, %c0_i32 : i32
    %c1_i32 = arith.constant 1 : i32
    %5 = arith.select %4, %c1_i32, %c16_i32 : i32
    %6 = vector.broadcast %5 : i32 to vector<32x128xi32>
    %7 = arith.remsi %3, %6 : vector<32x128xi32>
    %c0_i32_3 = arith.constant 0 : i32
    %8 = vector.broadcast %c0_i32_3 : i32 to vector<32x128xi32>
    %9 = arith.cmpi ne, %7, %8 : vector<32x128xi32>
    %c0_i32_4 = arith.constant 0 : i32
    %10 = vector.broadcast %c0_i32_4 : i32 to vector<32x128xi32>
    %11 = arith.cmpi slt, %7, %10 : vector<32x128xi32>
    %c0_i32_5 = arith.constant 0 : i32
    %12 = arith.cmpi slt, %5, %c0_i32_5 : i32
    %13 = vector.broadcast %12 : i1 to vector<32x128xi1>
    %14 = vector.broadcast %13 : vector<32x128xi1> to vector<32x128xi1>
    %15 = arith.xori %11, %14 : vector<32x128xi1>
    %16 = arith.andi %15, %9 : vector<32x128xi1>
    %17 = vector.broadcast %5 : i32 to vector<32x128xi32>
    %18 = arith.addi %7, %17 : vector<32x128xi32>
    %19 = arith.select %16, %18, %7 : vector<32x128xi1>, vector<32x128xi32>
    %c0_i32_6 = arith.constant 0 : i32
    %20 = vector.broadcast %c0_i32_6 : i32 to vector<32x128xi32>
    %21 = arith.cmpi eq, %19, %20 : vector<32x128xi32>
    %c1_i32_7 = arith.constant 1 : i32
    %22 = tpu.dynamic_rotate %1 by %c1_i32_7 dim 0 : vector<32x128xf32>, i32 -> vector<32x128xf32>
    %cst = arith.constant 0.000000e+00 : f32
    %23 = vector.broadcast %cst : f32 to vector<32x128xf32>
    %24 = arith.select %21, %23, %22 : vector<32x128xi1>, vector<32x128xf32>
    %c15_i32 = arith.constant 15 : i32
    %25 = vector.broadcast %c15_i32 : i32 to vector<32x128xi32>
    %26 = arith.cmpi eq, %19, %25 : vector<32x128xi32>
    %c31_i32 = arith.constant 31 : i32
    %27 = tpu.dynamic_rotate %1 by %c31_i32 dim 0 : vector<32x128xf32>, i32 -> vector<32x128xf32>
    %cst_8 = arith.constant 0.000000e+00 : f32
    %28 = vector.broadcast %cst_8 : f32 to vector<32x128xf32>
    %29 = arith.select %26, %28, %27 : vector<32x128xi1>, vector<32x128xf32>
    %30 = tpu.concatenate %24, %1, %29 in 1 : vector<32x128xf32>, vector<32x128xf32>, vector<32x128xf32> -> vector<32x384xf32>
    %31 = arith.truncf %30 : vector<32x384xf32> to vector<32x384xbf16>
    %c0_9 = arith.constant 0 : index
    %c0_10 = arith.constant 0 : index
    %32 = vector.load %arg2[%c0_9, %c0_10] : memref<384x128xbf16, #tpu.memory_space<vmem>>, vector<384x128xbf16>
    %cst_11 = arith.constant dense<0.000000e+00> : vector<32x128xf32>
    %33 = tpu.matmul %31, %32, %cst_11 {dimension_numbers = #tpu.dot_dimension_numbers<[1], [0], [0], [1], [0, 0, 1, 1], [], []>} : vector<32x384xbf16>, vector<384x128xbf16>, vector<32x128xf32> -> vector<32x128xf32>
    %34 = vector.broadcast %2 : vector<1x128xf32> to vector<32x128xf32>
    %35 = arith.addf %33, %34 : vector<32x128xf32>
    %cst_12 = arith.constant 0.000000e+00 : f32
    %36 = vector.broadcast %cst_12 : f32 to vector<32x128xf32>
    %37 = arith.maximumf %35, %36 : vector<32x128xf32>
    %c0_13 = arith.constant 0 : index
    %c0_14 = arith.constant 0 : index
    %38 = vector.load %arg5[%c0_13, %c0_14] : memref<1x128xf32, #tpu.memory_space<vmem>>, vector<1x128xf32>
    %39 = tpu.iota {dimensions = array<i32: 0>} : vector<32x128xi32>
    %c16_i32_15 = arith.constant 16 : i32
    %c0_i32_16 = arith.constant 0 : i32
    %40 = arith.cmpi eq, %c16_i32_15, %c0_i32_16 : i32
    %c1_i32_17 = arith.constant 1 : i32
    %41 = arith.select %40, %c1_i32_17, %c16_i32_15 : i32
    %42 = vector.broadcast %41 : i32 to vector<32x128xi32>
    %43 = arith.remsi %39, %42 : vector<32x128xi32>
    %c0_i32_18 = arith.constant 0 : i32
    %44 = vector.broadcast %c0_i32_18 : i32 to vector<32x128xi32>
    %45 = arith.cmpi ne, %43, %44 : vector<32x128xi32>
    %c0_i32_19 = arith.constant 0 : i32
    %46 = vector.broadcast %c0_i32_19 : i32 to vector<32x128xi32>
    %47 = arith.cmpi slt, %43, %46 : vector<32x128xi32>
    %c0_i32_20 = arith.constant 0 : i32
    %48 = arith.cmpi slt, %41, %c0_i32_20 : i32
    %49 = vector.broadcast %48 : i1 to vector<32x128xi1>
    %50 = vector.broadcast %49 : vector<32x128xi1> to vector<32x128xi1>
    %51 = arith.xori %47, %50 : vector<32x128xi1>
    %52 = arith.andi %51, %45 : vector<32x128xi1>
    %53 = vector.broadcast %41 : i32 to vector<32x128xi32>
    %54 = arith.addi %43, %53 : vector<32x128xi32>
    %55 = arith.select %52, %54, %43 : vector<32x128xi1>, vector<32x128xi32>
    %c0_i32_21 = arith.constant 0 : i32
    %56 = vector.broadcast %c0_i32_21 : i32 to vector<32x128xi32>
    %57 = arith.cmpi eq, %55, %56 : vector<32x128xi32>
    %c1_i32_22 = arith.constant 1 : i32
    %58 = tpu.dynamic_rotate %37 by %c1_i32_22 dim 0 : vector<32x128xf32>, i32 -> vector<32x128xf32>
    %cst_23 = arith.constant 0.000000e+00 : f32
    %59 = vector.broadcast %cst_23 : f32 to vector<32x128xf32>
    %60 = arith.select %57, %59, %58 : vector<32x128xi1>, vector<32x128xf32>
    %c15_i32_24 = arith.constant 15 : i32
    %61 = vector.broadcast %c15_i32_24 : i32 to vector<32x128xi32>
    %62 = arith.cmpi eq, %55, %61 : vector<32x128xi32>
    %c31_i32_25 = arith.constant 31 : i32
    %63 = tpu.dynamic_rotate %37 by %c31_i32_25 dim 0 : vector<32x128xf32>, i32 -> vector<32x128xf32>
    %cst_26 = arith.constant 0.000000e+00 : f32
    %64 = vector.broadcast %cst_26 : f32 to vector<32x128xf32>
    %65 = arith.select %62, %64, %63 : vector<32x128xi1>, vector<32x128xf32>
    %66 = tpu.concatenate %60, %37, %65 in 1 : vector<32x128xf32>, vector<32x128xf32>, vector<32x128xf32> -> vector<32x384xf32>
    %67 = arith.truncf %66 : vector<32x384xf32> to vector<32x384xbf16>
    %c0_27 = arith.constant 0 : index
    %c0_28 = arith.constant 0 : index
    %68 = vector.load %arg4[%c0_27, %c0_28] : memref<384x128xbf16, #tpu.memory_space<vmem>>, vector<384x128xbf16>
    %cst_29 = arith.constant dense<0.000000e+00> : vector<32x128xf32>
    %69 = tpu.matmul %67, %68, %cst_29 {dimension_numbers = #tpu.dot_dimension_numbers<[1], [0], [0], [1], [0, 0, 1, 1], [], []>} : vector<32x384xbf16>, vector<384x128xbf16>, vector<32x128xf32> -> vector<32x128xf32>
    %70 = vector.broadcast %38 : vector<1x128xf32> to vector<32x128xf32>
    %71 = arith.addf %69, %70 : vector<32x128xf32>
    %cst_30 = arith.constant 0.000000e+00 : f32
    %72 = vector.broadcast %cst_30 : f32 to vector<32x128xf32>
    %73 = arith.maximumf %71, %72 : vector<32x128xf32>
    %c0_31 = arith.constant 0 : index
    %c0_32 = arith.constant 0 : index
    %74 = vector.load %arg6[%c0_31, %c0_32] : memref<32x128xf32, #tpu.memory_space<vmem>>, vector<32x128xf32>
    tpu.vector_store %arg6[%c0_31, %c0_32], %73 {strides = array<i32>} : memref<32x128xf32, #tpu.memory_space<vmem>>, vector<32x128xf32>,
    return
  }
  func.func @transform_0(%arg0: i32) -> (i32, i32) {
    %c0_i32 = arith.constant 0 : i32
    %c0_i32_0 = arith.constant 0 : i32
    return %arg0, %c0_i32 : i32, i32
  }
  func.func @transform_1(%arg0: i32) -> (i32, i32) {
    %c0_i32 = arith.constant 0 : i32
    %c0_i32_0 = arith.constant 0 : i32
    %c0_i32_1 = arith.constant 0 : i32
    return %c0_i32, %c0_i32_0 : i32, i32
  }
  func.func @transform_2(%arg0: i32) -> (i32, i32) {
    %c0_i32 = arith.constant 0 : i32
    %c0_i32_0 = arith.constant 0 : i32
    %c0_i32_1 = arith.constant 0 : i32
    return %c0_i32, %c0_i32_0 : i32, i32
  }
  func.func @transform_3(%arg0: i32) -> (i32, i32) {
    %c0_i32 = arith.constant 0 : i32
    %c0_i32_0 = arith.constant 0 : i32
    %c0_i32_1 = arith.constant 0 : i32
    return %c0_i32, %c0_i32_0 : i32, i32
  }
  func.func @transform_4(%arg0: i32) -> (i32, i32) {
    %c0_i32 = arith.constant 0 : i32
    %c0_i32_0 = arith.constant 0 : i32
    %c0_i32_1 = arith.constant 0 : i32
    return %c0_i32, %c0_i32_0 : i32, i32
  }
  func.func @transform_5(%arg0: i32) -> (i32, i32) {
    %c0_i32 = arith.constant 0 : i32
    %c0_i32_0 = arith.constant 0 : i32
    return %arg0, %c0_i32 : i32, i32
  }
}

</mosaic_0001>

<bundles_post_ra>
// kernel: convblock_apply.1
= control target key start
LH: loop header
LB: loop body
LE: loop exit
PB: predicated region body
PF: predicated region fallthrough
CT: control target
= control target key end

     0   :  { %v30_v8 = vlaneseq  ;;  %vm1019_vm6 = vmmov 1   ;;  %s1318_s1 = inlined_call_operand.vmem [shape: bf16[384,128], index: 1, kind: input, shape index: {}]   ;;  %s1319_s0 = inlined_call_operand.vmem [shape: bf16[32,128], index: 0, kind: input, shape index: {}]   ;;  %s1320_s3 = inlined_call_operand.vmem [shape: bf16[384,128], index: 3, kind: input, shape index: {}]   ;;  %s1321_s2 = inlined_call_operand.vmem [shape: f32[1,128], index: 2, kind: input, shape index: {}]   ;;  %s1322_s4 = inlined_call_operand.vmem [shape: f32[1,128], index: 4, kind: input, shape index: {}]   ;;  %s1323_s5 = inlined_call_operand.vmem [shape: f32[32,128], index: 5, kind: output, shape index: {}]  }
   0x1   :  { %v967_v0 = vld [vmem:[%s1318_s1 + $0x40] sm:$0xff]   ;;  %v969_v2 = vld [vmem:[%s1318_s1 + $0x48] sm:$0xff]   ;;  %v972_v5 = vld [vmem:[%s1318_s1 + $0x50] sm:$0xff]  }
   0x2   :  { %v968_v1 = vld [vmem:[%s1318_s1] sm:$0xff]   ;;  %850 = vmatprep.subr.bf16.mxu0 %v967_v0  ;;  %v971_v4 = vld [vmem:[%s1318_s1 + $0x8] sm:$0xff]   ;;  %v974_v7 = vld [vmem:[%s1318_s1 + $0x10] sm:$0xff]   ;;  %v1086_v13 = vshrl.u32 %v30_v8, 7 }
   0x3   :  { %851 = vmatpush3.bf16.msra.mxu0 %v968_v1  ;;  %v970_v3 = vld [vmem:[%s1318_s1 + $0x80] sm:$0xff]   ;;  %v973_v6 = vld [vmem:[%s1318_s1 + $0x88] sm:$0xff]   ;;  %v975_v9 = vld [vmem:[%s1318_s1 + $0x58] sm:$0xff]  }
   0x4   :  { %852 = vmatprep.subr.bf16.mxu0 %v969_v2  ;;  %926 = vmatprep.subr.bf16.mxu1 %v970_v3  ;;  %v976_v10 = vld [vmem:[%s1318_s1 + $0x90] sm:$0xff]   ;;  %v977_v11 = vld [vmem:[%s1318_s1 + $0x18] sm:$0xff]   ;;  %v978_v12 = vld [vmem:[%s1318_s1 + $0x60] sm:$0xff]   ;;  %v32_v17 = vadd.s32 8, %v1086_v13  ;;  %v34_v19 = vadd.s32 24, %v1086_v13  ;;  %v33_v20 = vadd.s32 16, %v1086_v13 }
   0x5   :  { %927 = vmatpush3.bf16.msra.mxu1 %v970_v3  ;;  %v979_v14 = vld [vmem:[%s1318_s1 + $0x98] sm:$0xff]   ;;  %v980_v15 = vld [vmem:[%s1318_s1 + $0x20] sm:$0xff]   ;;  %v981_v18 = vld [vmem:[%s1318_s1 + $0x68] sm:$0xff]   ;;  %v39_v22 = vand.u32 15, %v1086_v13  ;;  %vm91_vm0 = vcmp.lt.s32.totalorder %v1086_v13, 1  ;;  %vm108_vm2 = vcmp.lt.s32.totalorder %v1086_v13, 7 }
   0x6   :  { %928 = vmatprep.subr.bf16.mxu1 %v973_v6  ;;  %v982_v16 = vld [vmem:[%s1318_s1 + $0xa0] sm:$0xff]   ;;  %v983_v21 = vld [vmem:[%s1318_s1 + $0x28] sm:$0xff]   ;;  %v46_v24 = vand.u32 15, %v32_v17  ;;  %v984_v25 = vld [vmem:[%s1318_s1 + $0x70] sm:$0xff]   ;;  %v60_v26 = vand.u32 15, %v34_v19  ;;  %v53_v27 = vand.u32 15, %v33_v20 }
   0x7   :  { %853 = vmatpush3.bf16.msra.mxu0 %v971_v4  ;;  %v985_v23 = vld [vmem:[%s1318_s1 + $0xa8] sm:$0xff]   ;;  %v986_v28 = vld [vmem:[%s1318_s1 + $0x30] sm:$0xff]   ;;  %v21_v30 = vld [vmem:[%s1319_s0] sm:$0xff]   ;;  %vm1126_vm1 = vcmp.ne.s32.totalorder %v39_v22, 0 }
   0x8   :  { %854 = vmatprep.subr.bf16.mxu0 %v972_v5  ;;  %v988_v29 = vld [vmem:[%s1318_s1 + $0xb0] sm:$0xff]   ;;  %v23_v31 = vld [vmem:[%s1319_s0 + $0x8] sm:$0xff]   ;;  %vm1131_vm3 = vcmp.ne.s32.totalorder %v46_v24, 15  ;;  %v987_v34 = vld [vmem:[%s1318_s1 + $0x78] sm:$0xff]   ;;  %v25_v35 = vunpack.c.l.bf16 %v21_v30  ;;  %v26_v36 = vunpack.c.h.bf16 %v21_v30  ;;  %vm1138_vm4 = vcmp.ne.s32.totalorder %v60_v26, 15  ;;  %353 = vmatprep.mubr.bf16.mxu0 %v21_v30 }
   0x9   :  { %929 = vmatpush3.bf16.msra.mxu1 %v973_v6  ;;  %v28_v37 = vunpack.c.h.bf16 %v23_v31  ;;  %v27_v38 = vunpack.c.l.bf16 %v23_v31  ;;  %vm1142_vm5 = vcmp.ne.s32.totalorder %v53_v27, 0  ;;  %v989_v41 = vld [vmem:[%s1318_s1 + $0x38] sm:$0xff]   ;;  %vm1152_vm7 = vmpackc.low %vm1019_vm6, %vm1126_vm1  ;;  %v993_v52 = vld [vmem:[%s1320_s3 + $0x40] sm:$0xff]  }
   0xa   :  { %930 = vmatprep.subr.bf16.mxu1 %v976_v10  ;;  %v87_v42 = vrot.slane %v25_v35, 7  ;;  %v88_v43 = vrot.slane %v26_v36, 7  ;;  %v104_v45 = vrot.slane %v25_v35, 1  ;;  %v991_v47 = vld [vmem:[%s1318_s1 + $0xb8] sm:$0xff]   ;;  %v105_v48 = vrot.slane %v26_v36, 1  ;;  %vm1162_vm8 = vmpackc.low %vm1131_vm3, %vm1019_vm6  ;;  %v994_v62 = vld [vmem:[%s1320_s3 + $0x80] sm:$0xff]  }
   0xb   :  { %855 = vmatpush3.bf16.msra.mxu0 %v974_v7  ;;  %v90_v44 = vrot.slane %v28_v37, 7  ;;  %v107_v49 = vrot.slane %v28_v37, 1  ;;  %v106_v50 = vrot.slane %v27_v38, 1  ;;  %vm1180_vm9 = vmpackc.low %vm1138_vm4, %vm1019_vm6  ;;  %v89_v63 = vrot.slane %v27_v38, 7  ;;  %v995_v1 = vld [vmem:[%s1320_s3] sm:$0xff]   ;;  %v996_v2 = vld [vmem:[%s1320_s3 + $0x48] sm:$0xff]  }
   0xc   :  { %856 = vmatprep.subr.bf16.mxu0 %v975_v9  ;;  %v94_v53 = vsel %vm91_vm0, %v87_v42, %v88_v43  ;;  %v111_v56 = vsel %vm108_vm2, %v104_v45, %v105_v48  ;;  %vm1194_vm10 = vmpackc.low %vm1019_vm6, %vm1142_vm5  ;;  %v997_v4 = vld [vmem:[%s1320_s3 + $0x88] sm:$0xff]   ;;  %v999_v9 = vld [vmem:[%s1320_s3 + $0x50] sm:$0xff]  }
   0xd   :  { %931 = vmatpush3.bf16.msra.mxu1 %v976_v10  ;;  %v95_v54 = vsel %vm91_vm0, %v90_v44, %v87_v42  ;;  %v110_v55 = vsel %vm108_vm2, %v105_v48, %v106_v50  ;;  %v109_v60 = vsel %vm108_vm2, %v106_v50, %v107_v49  ;;  %v112_v61 = vsel %vm108_vm2, %v107_v49, %v104_v45  ;;  %v998_v5 = vld [vmem:[%s1320_s3 + $0x8] sm:$0xff]   ;;  %v1000_v10 = vld [vmem:[%s1320_s3 + $0x90] sm:$0xff]   ;;  %v1006_v17 = vld [vmem:[%s1320_s3 + $0xa0] sm:$0xff]  }
   0xe   :  { %932 = vmatprep.subr.bf16.mxu1 %v979_v14  ;;  %v791_v58 = vpack.c.bf16 %v94_v53, %v95_v54  ;;  %v799_v59 = vpack.c.bf16 %v110_v55, %v111_v56  ;;  %v803_v3 = vpack.c.bf16 %v112_v61, %v109_v60  ;;  %v92_v6 = vsel %vm91_vm0, %v89_v63, %v90_v44  ;;  %v1008_v19 = vld [vmem:[%s1320_s3 + $0x68] sm:$0xff]   ;;  %v1011_v22 = vld [vmem:[%s1320_s3 + $0x70] sm:$0xff]   ;;  %v1015_v26 = vld [vmem:[%s1320_s3 + $0xb8] sm:$0xff]  }
   0xf   :  { %857 = vmatpush3.bf16.msra.mxu0 %v977_v11  ;;  %v93_v7 = vsel %vm91_vm0, %v88_v43, %v89_v63  ;;  %v1001_v11 = vld [vmem:[%s1320_s3 + $0x10] sm:$0xff]   ;;  %v1009_v20 = vld [vmem:[%s1320_s3 + $0xa8] sm:$0xff]   ;;  %v1016_v27 = vld [vmem:[%s1320_s3 + $0x38] sm:$0xff]  }
  0x10   :  { %858 = vmatprep.subr.bf16.mxu0 %v978_v12  ;;  %942 = vmatprep.mubr.msk.bf16.mxu1 %vm1162_vm8, %v799_v59  ;;  %v795_v8 = vpack.c.bf16 %v92_v6, %v93_v7  ;;  %v1002_v12 = vld [vmem:[%s1320_s3 + $0x58] sm:$0xff]   ;;  %v1013_v24 = vld [vmem:[%s1320_s3 + $0x30] sm:$0xff]   ;;  %v764_v30 = vld [vmem:[%s1321_s2] ss:$0 sm:$0xff] }
  0x11   :  { %933 = vmatpush3.bf16.msra.mxu1 %v979_v14  ;;  %v1003_v14 = vld [vmem:[%s1320_s3 + $0x98] sm:$0xff]   ;;  %v805_v51 = vld [vmem:[%s1322_s4] ss:$0 sm:$0xff] }
  0x12   :  { %934 = vmatprep.subr.bf16.mxu1 %v982_v16 }
  0x13   :  { %859 = vmatpush3.bf16.msra.mxu0 %v980_v15  ;;  %v1004_v15 = vld [vmem:[%s1320_s3 + $0x18] sm:$0xff]  }
  0x14   :  { %860 = vmatprep.subr.bf16.mxu0 %v981_v18  ;;  %v1007_v18 = vld [vmem:[%s1320_s3 + $0x20] sm:$0xff]  }
  0x15   :  { %935 = vmatpush3.bf16.msra.mxu1 %v982_v16  ;;  %v1005_v16 = vld [vmem:[%s1320_s3 + $0x60] sm:$0xff]  }
  0x16   :  { %936 = vmatprep.subr.bf16.mxu1 %v985_v23 }
  0x17   :  { %861 = vmatpush3.bf16.msra.mxu0 %v983_v21  ;;  %v1010_v21 = vld [vmem:[%s1320_s3 + $0x28] sm:$0xff]  }
  0x18   :  { %862 = vmatprep.subr.bf16.mxu0 %v984_v25  ;;  %v1014_v25 = vld [vmem:[%s1320_s3 + $0x78] sm:$0xff]  }
  0x19   :  { %937 = vmatpush3.bf16.msra.mxu1 %v985_v23  ;;  %v1012_v23 = vld [vmem:[%s1320_s3 + $0xb0] sm:$0xff]  }
  0x1a   :  { %938 = vmatprep.subr.bf16.mxu1 %v988_v29 }
  0x1b   :  { %863 = vmatpush3.bf16.msra.mxu0 %v986_v28 }
  0x1c   :  { %864 = vmatprep.subr.bf16.mxu0 %v987_v34 }
  0x1d   :  { %939 = vmatpush3.bf16.msra.mxu1 %v988_v29 }
  0x1e   :  { %940 = vmatprep.subr.bf16.mxu1 %v991_v47 }
  0x1f   :  { %865 = vmatpush3.bf16.msra.mxu0 %v989_v41 }
  0x20   :  { %888 = vmatprep.subr.bf16.mxu0 %v993_v52 }
  0x21   :  { %941 = vmatpush3.bf16.msra.mxu1 %v991_v47 }
  0x22   :  { %792 = vmatmul.mubr.msk.bf16.vlgmr.msra.gmra.mrb[0].mxu0 %vm1152_vm7, %v791_v58  ;;  %946 = vmatprep.subr.bf16.mxu1 %v994_v62 }
  0x23   :  { %361 = vmatprep.mubr.bf16.mxu0 %v23_v31  ;;  %889 = vmatpush3.bf16.msra.mxu0 %v995_v1 }
  0x24   :  { %943 = vmatmul.mubr.msk.bf16.vlgmr.msra.gmra.mrb[0].mxu1 %vm1180_vm9, %v803_v3  ;;  %890 = vmatprep.subr.bf16.mxu0 %v996_v2 }
  0x25   :  { %947 = vmatpush3.bf16.msra.mxu1 %v994_v62 }
  0x26   :  { %948 = vmatprep.subr.bf16.mxu1 %v997_v4 }
  0x27   :  { %891 = vmatpush3.bf16.msra.mxu0 %v998_v5 }
  0x28   :  { %892 = vmatprep.subr.bf16.mxu0 %v999_v9 }
  0x29   :  { %949 = vmatpush3.bf16.msra.mxu1 %v997_v4 }
  0x2a   :  { %796 = vmatmul.mubr.msk.bf16.gmra.mrb[4].mxu0 %vm1194_vm10, %v795_v8  ;;  %950 = vmatprep.subr.bf16.mxu1 %v1000_v10 }
  0x2b   :  { %893 = vmatpush3.bf16.msra.mxu0 %v1001_v11 }
  0x2c   :  { %894 = vmatprep.subr.bf16.mxu0 %v1002_v12 }
  0x2d   :  { %951 = vmatpush3.bf16.msra.mxu1 %v1000_v10 }
  0x2e   :  { %952 = vmatprep.subr.bf16.mxu1 %v1003_v14 }
  0x2f   :  { %895 = vmatpush3.bf16.msra.mxu0 %v1004_v15 }
  0x30   :  { %896 = vmatprep.subr.bf16.mxu0 %v1005_v16 }
  0x31   :  { %953 = vmatpush3.bf16.msra.mxu1 %v1003_v14 }
  0x32   :  { %954 = vmatprep.subr.bf16.mxu1 %v1006_v17 }
  0x33   :  { %897 = vmatpush3.bf16.msra.mxu0 %v1007_v18 }
  0x34   :  { %898 = vmatprep.subr.bf16.mxu0 %v1008_v19 }
  0x35   :  { %955 = vmatpush3.bf16.msra.mxu1 %v1006_v17 }
  0x36   :  { %956 = vmatprep.subr.bf16.mxu1 %v1009_v20 }
  0x37   :  { %899 = vmatpush3.bf16.msra.mxu0 %v1010_v21 }
  0x38   :  { %900 = vmatprep.subr.bf16.mxu0 %v1011_v22 }
  0x39   :  { %957 = vmatpush3.bf16.msra.mxu1 %v1009_v20 }
  0x3a   :  { %958 = vmatprep.subr.bf16.mxu1 %v1012_v23 }
  0x3b   :  { %901 = vmatpush3.bf16.msra.mxu0 %v1013_v24 }
  0x3c   :  { %902 = vmatprep.subr.bf16.mxu0 %v1014_v25 }
  0x3d   :  { %959 = vmatpush3.bf16.msra.mxu1 %v1012_v23 }
  0x3e   :  { %960 = vmatprep.subr.bf16.mxu1 %v1015_v26 }
  0x3f   :  { %903 = vmatpush3.bf16.msra.mxu0 %v1016_v27 }
  0x41   :  { %961 = vmatpush3.bf16.msra.mxu1 %v1015_v26 }
  0xf5   :  { %v866_v28 = vpop.f32.mrb[0].mxu0 }
  0xf6   :  { %v867_v29 = vpop.f32.mrb[1].mxu0 }
  0xf7   :  { %v868_v31 = vadd.f32 %v867_v29, %v866_v28  ;;  %v869_v32 = vpop.f32.mrb[2].mxu0  ;;  %v944_v34 = vpop.f32.mrb[0].mxu1 }
  0xf8   :  { %v870_v33 = vpop.f32.mrb[3].mxu0  ;;  %v404_v37 = vpop.f32.mrb[1].mxu1 }
  0xf9   :  { %v871_v35 = vadd.f32 %v870_v33, %v869_v32  ;;  %v356_v36 = vadd.f32 %v868_v31, %v764_v30  ;;  %v945_v38 = vpop.f32.mrb[2].mxu1 }
  0xfa   :  { %v407_v41 = vpop.f32.mrb[3].mxu1 }
  0xfb   :  { %v405_v39 = vadd.f32 %v404_v37, %v356_v36  ;;  %v359_v40 = vadd.f32 %v871_v35, %v764_v30 }
  0xfd   :  { %v419_v42 = vmax.f32 %v405_v39, 0.0  ;;  %v408_v43 = vadd.f32 %v407_v41, %v359_v40  ;;  %v872_v44 = vpop.f32.mrb[4].mxu0 }
  0xfe   :  { %v873_v45 = vpop.f32.mrb[5].mxu0 }
  0xff   :  { %v420_v47 = vmax.f32 %v408_v43, 0.0  ;;  %v874_v48 = vadd.f32 %v873_v45, %v872_v44  ;;  %v875_v49 = vpop.f32.mrb[6].mxu0  ;;  %v424_v50 = vrot.slane %v419_v42, 7  ;;  %v436_v52 = vrot.slane %v419_v42, 1 }
 0x100   :  { %v876_v53 = vpop.f32.mrb[7].mxu0 }
 0x101   :  { %v425_v54 = vrot.slane %v420_v47, 7  ;;  %v437_v55 = vrot.slane %v420_v47, 1  ;;  %v364_v56 = vadd.f32 %v874_v48, %v764_v30  ;;  %v877_v58 = vadd.f32 %v876_v53, %v875_v49 }
 0x102   :  { %v449_v59 = vpack.c.bf16 %v420_v47, %v419_v42 }
 0x103   :  { %v430_v60 = vsel %vm91_vm0, %v424_v50, %v425_v54  ;;  %v413_v61 = vadd.f32 %v944_v34, %v364_v56  ;;  %v367_v62 = vadd.f32 %v877_v58, %v764_v30  ;;  %v442_v63 = vsel %vm108_vm2, %v436_v52, %v437_v55 }
 0x104   :  { %684 = vmatprep.mubr.bf16.mxu0 %v449_v59 }
 0x105   :  { %v421_v1 = vmax.f32 %v413_v61, 0.0  ;;  %v416_v2 = vadd.f32 %v945_v38, %v367_v62 }
 0x107   :  { %v426_v3 = vrot.slane %v421_v1, 7  ;;  %v438_v4 = vrot.slane %v421_v1, 1  ;;  %v422_v5 = vmax.f32 %v416_v2, 0.0 }
 0x109   :  { %v427_v6 = vrot.slane %v422_v5, 7  ;;  %v439_v7 = vrot.slane %v422_v5, 1  ;;  %v441_v8 = vsel %vm108_vm2, %v437_v55, %v438_v4  ;;  %v452_v9 = vpack.c.bf16 %v422_v5, %v421_v1 }
 0x10a   :  { %v840_v10 = vpack.c.bf16 %v441_v8, %v442_v63  ;;  %v429_v11 = vsel %vm91_vm0, %v425_v54, %v426_v3 }
 0x10b   :  { %v431_v12 = vsel %vm91_vm0, %v427_v6, %v424_v50  ;;  %v440_v14 = vsel %vm108_vm2, %v438_v4, %v439_v7  ;;  %v443_v15 = vsel %vm108_vm2, %v439_v7, %v436_v52  ;;  %v428_v16 = vsel %vm91_vm0, %v426_v3, %v427_v6 }
 0x10c   :  { %v832_v17 = vpack.c.bf16 %v430_v60, %v431_v12  ;;  %962 = vmatprep.mubr.msk.bf16.mxu1 %vm1162_vm8, %v840_v10  ;;  %v844_v18 = vpack.c.bf16 %v443_v15, %v440_v14  ;;  %v836_v19 = vpack.c.bf16 %v428_v16, %v429_v11 }
 0x10e   :  { %833 = vmatmul.mubr.msk.bf16.vlgmr.msra.gmra.mrb[8].mxu0 %vm1152_vm7, %v832_v17  ;;  %963 = vmatmul.mubr.msk.bf16.vlgmr.msra.gmra.mrb[4].mxu1 %vm1180_vm9, %v844_v18 }
 0x10f   :  { %692 = vmatprep.mubr.bf16.mxu0 %v452_v9 }
 0x116   :  { %837 = vmatmul.mubr.msk.bf16.gmra.mrb[12].mxu0 %vm1194_vm10, %v836_v19 }
 0x1e1   :  { %v904_v20 = vpop.f32.mrb[8].mxu0  ;;  %v964_v21 = vpop.f32.mrb[4].mxu1 }
 0x1e2   :  { %v905_v13 = vpop.f32.mrb[9].mxu0  ;;  %v735_v22 = vpop.f32.mrb[5].mxu1 }
 0x1e3   :  { %v906_v23 = vadd.f32 %v905_v13, %v904_v20  ;;  %v907_v24 = vpop.f32.mrb[10].mxu0  ;;  %v965_v25 = vpop.f32.mrb[6].mxu1 }
 0x1e4   :  { %v908_v46 = vpop.f32.mrb[11].mxu0  ;;  %v738_v26 = vpop.f32.mrb[7].mxu1 }
 0x1e5   :  { %v687_v27 = vadd.f32 %v906_v23, %v805_v51  ;;  %v909_v57 = vadd.f32 %v908_v46, %v907_v24 }
 0x1e7   :  { %v736_v28 = vadd.f32 %v735_v22, %v687_v27  ;;  %v690_v29 = vadd.f32 %v909_v57, %v805_v51 }
 0x1e9   :  { %v750_v30 = vmax.f32 %v736_v28, 0.0  ;;  %v739_v0 = vadd.f32 %v738_v26, %v690_v29  ;;  %v910_v31 = vpop.f32.mrb[12].mxu0 }
 0x1ea   :  { %v911_v32 = vpop.f32.mrb[13].mxu0 }
 0x1eb   :  { %754 = vst [vmem:[%s1323_s5] sm:$0xff] %v750_v30  ;;  %v751_v33 = vmax.f32 %v739_v0, 0.0  ;;  %v912_v34 = vadd.f32 %v911_v32, %v910_v31  ;;  %v913_v35 = vpop.f32.mrb[14].mxu0 }
 0x1ec   :  { %v914_v36 = vpop.f32.mrb[15].mxu0 }
 0x1ed   :  { %755 = vst [vmem:[%s1323_s5 + $0x8] sm:$0xff] %v751_v33  ;;  %v695_v37 = vadd.f32 %v912_v34, %v805_v51  ;;  %v915_v38 = vadd.f32 %v914_v36, %v913_v35 }
 0x1ef   :  { %v744_v39 = vadd.f32 %v964_v21, %v695_v37  ;;  %v698_v40 = vadd.f32 %v915_v38, %v805_v51 }
 0x1f1   :  { %v752_v41 = vmax.f32 %v744_v39, 0.0  ;;  %v747_v42 = vadd.f32 %v965_v25, %v698_v40 }
 0x1f3   :  { %756 = vst [vmem:[%s1323_s5 + $0x10] sm:$0xff] %v752_v41  ;;  %v753_v43 = vmax.f32 %v747_v42, 0.0 }
 0x1f5   :  { %757 = vst [vmem:[%s1323_s5 + $0x18] sm:$0xff] %v753_v43 }

</bundles_post_ra>
